<compile_context>
chip_gen: v6e
topology: v6e:2x2x1
jax: 0.10.0
libtpu: 0.0.40
codegen_flags: <defaults>
</compile_context>

<pallas_src>
import functools

import jax
import jax.numpy as jnp
from jax import lax
from jax.experimental import pallas as pl
from jax.experimental.pallas import tpu as pltpu


def _round_up(x: int, m: int) -> int:
    return ((x + m - 1) // m) * m


def _hard_triplet_kernel(emb_rows_ref, emb_cols_ref, sq_row_ref, sq_col_ref,
                         lab_row_ref, lab_col_ref, out_ref,
                         maxpos_ref, minneg_ref, maxall_ref, *,
                         margin, squared, b_real, tm, tn):
    i = pl.program_id(0)    # anchor row tile   ("parallel")
    kv = pl.program_id(1)   # column tile       ("arbitrary" reduction)

    @pl.when(kv == 0)
    def _init():
        maxpos_ref[...] = jnp.zeros((tm, 1), jnp.float32)
        minneg_ref[...] = jnp.full((tm, 1), jnp.inf, jnp.float32)
        maxall_ref[...] = jnp.zeros((tm, 1), jnp.float32)

    emb_rows = emb_rows_ref[...]          # (TM, D)  native dtype
    emb_cols = emb_cols_ref[...]          # (TN, D)  native dtype
    sq_row = sq_row_ref[...]              # (TM, 1)  f32  ||anchor||^2
    sq_col = sq_col_ref[...]              # (1, TN)  f32  ||col||^2
    lab_row = lab_row_ref[...]            # (TM, 1)  int32
    lab_col = lab_col_ref[...]            # (1, TN)  int32

    # dot[a, j] = <e_a, e_j>  -> MXU, f32 accumulation.
    dot = lax.dot_general(
        emb_rows, emb_cols,
        dimension_numbers=(((1,), (1,)), ((), ())),
        preferred_element_type=jnp.float32,
    )                                                             # (TM, TN)

    # Pairwise (squared) euclidean distances, clamped at 0.
    d = sq_row - 2.0 * dot + sq_col
    d = jnp.maximum(d, 0.0)
    if not squared:
        # (1 - mask) * sqrt(d + mask*1e-16)  ==  where(d > 0, sqrt(d), 0)
        d = jnp.where(d > 0.0, jnp.sqrt(d), 0.0)

    # Global index helpers for this (row tile, column tile).
    row_ids = i * tm + lax.broadcasted_iota(jnp.int32, (tm, tn), 0)
    col_ids = kv * tn + lax.broadcasted_iota(jnp.int32, (tm, tn), 1)
    not_self = row_ids != col_ids
    col_valid = col_ids < b_real

    labels_equal = lab_row == lab_col                             # (TM, TN)

    pos_mask = jnp.logical_and(jnp.logical_and(labels_equal, not_self),
                               col_valid)
    neg_mask = jnp.logical_and(jnp.logical_not(labels_equal), col_valid)

    tile_pos = jnp.max(jnp.where(pos_mask, d, 0.0), axis=1, keepdims=True)
    tile_neg = jnp.min(jnp.where(neg_mask, d, jnp.inf), axis=1, keepdims=True)
    tile_all = jnp.max(jnp.where(col_valid, d, 0.0), axis=1, keepdims=True)

    maxpos_ref[...] = jnp.maximum(maxpos_ref[...], tile_pos)
    minneg_ref[...] = jnp.minimum(minneg_ref[...], tile_neg)
    maxall_ref[...] = jnp.maximum(maxall_ref[...], tile_all)

    @pl.when(kv == pl.num_programs(1) - 1)
    def _finalize():
        hp = maxpos_ref[...]
        # min(min_over_neg, max_over_all) == reference min(d + max*(1-neg)).
        hn = jnp.minimum(minneg_ref[...], maxall_ref[...])
        tl = jnp.maximum(hp - hn + margin, 0.0)
        row_valid = (i * tm
                     + lax.broadcasted_iota(jnp.int32, (tm, 1), 0)) < b_real
        tl = jnp.where(row_valid, tl, 0.0)        # drop padded anchor rows
        # Lane-dense per-row-tile partial sum; wrapper reads [i, 0, 0].
        out_ref[...] = jnp.full((1, 8, 128), jnp.sum(tl), dtype=jnp.float32)


def hard_triplet_loss(embeddings, targets, margin: float = 0.2,
                      squared: bool = False,
                      block_rows: int = 128, block_cols: int = 512):
    """JAX/Pallas equivalent of HardTripletLoss.forward(embeddings, targets)."""
    B, D = embeddings.shape

    block_rows = max(8, _round_up(block_rows, 8))
    block_cols = max(128, _round_up(block_cols, 128))

    tm = min(block_rows, _round_up(B, 8))       # anchor-row tile (mult of 8)
    tn = min(block_cols, _round_up(B, 128))     # column tile (mult of 128)
    b_rows = _round_up(B, tm)
    b_cols = _round_up(B, tn)
    g_rows = b_rows // tm
    g_cols = b_cols // tn

    pad_r = b_rows - B
    pad_c = b_cols - B

    # Row-side / column-side padded copies (padded rows/cols are masked
    # inside the kernel).  Embeddings stay in their native dtype (bf16 ok).
    emb_rows_arr = (jnp.pad(embeddings, ((0, pad_r), (0, 0)))
                    if pad_r else embeddings)
    emb_cols_arr = (jnp.pad(embeddings, ((0, pad_c), (0, 0)))
                    if pad_c else embeddings)

    lab = targets.astype(jnp.int32)
    lab_rows = (jnp.pad(lab, (0, pad_r), constant_values=-1)
                if pad_r else lab).reshape(b_rows, 1)
    lab_cols = (jnp.pad(lab, (0, pad_c), constant_values=-1)
                if pad_c else lab).reshape(1, b_cols)

    # ||e||^2 computed once (f32), fed row- and column-oriented so the kernel
    # needs no transposes or B x B diag tricks.
    emb32 = embeddings.astype(jnp.float32)
    sq = jnp.sum(emb32 * emb32, axis=1)                         # (B,)
    sq_rows = (jnp.pad(sq, (0, pad_r)) if pad_r else sq).reshape(b_rows, 1)
    sq_cols = (jnp.pad(sq, (0, pad_c)) if pad_c else sq).reshape(1, b_cols)

    kernel = functools.partial(_hard_triplet_kernel, margin=float(margin),
                               squared=bool(squared), b_real=B, tm=tm, tn=tn)

    itemsize = jnp.dtype(embeddings.dtype).itemsize
    cost = pl.CostEstimate(
        flops=2 * b_rows * b_cols * D,
        transcendentals=0 if squared else b_rows * b_cols,
        bytes_accessed=(b_rows * D * itemsize                  # row tiles (resident over kv)
                        + g_rows * b_cols * D * itemsize       # column tiles
                        + 4 * (b_rows + b_cols) * 4
                        + g_rows * 8 * 128 * 4),
    )

    partials = pl.pallas_call(
        kernel,
        out_shape=jax.ShapeDtypeStruct((g_rows, 8, 128), jnp.float32),
        grid=(g_rows, g_cols),
        in_specs=[
            pl.BlockSpec((tm, D), lambda i, k: (i, 0)),     # anchor row tile
            pl.BlockSpec((tn, D), lambda i, k: (k, 0)),     # column tile
            pl.BlockSpec((tm, 1), lambda i, k: (i, 0)),     # ||anchor||^2
            pl.BlockSpec((1, tn), lambda i, k: (0, k)),     # ||col||^2
            pl.BlockSpec((tm, 1), lambda i, k: (i, 0)),     # anchor labels
            pl.BlockSpec((1, tn), lambda i, k: (0, k)),     # column labels
        ],
        out_specs=pl.BlockSpec((1, 8, 128), lambda i, k: (i, 0, 0)),
        scratch_shapes=[pltpu.VMEM((tm, 1), jnp.float32),   # running max pos
                        pltpu.VMEM((tm, 1), jnp.float32),   # running min neg
                        pltpu.VMEM((tm, 1), jnp.float32)],  # running max all
        compiler_params=pltpu.CompilerParams(
            dimension_semantics=("parallel", "arbitrary"),
            vmem_limit_bytes=48 * 1024 * 1024),
        cost_estimate=cost,
    )(emb_rows_arr, emb_cols_arr, sq_rows, sq_cols, lab_rows, lab_cols)

    # Per-row-tile partial sums -> mean over the *real* batch.
    return jnp.sum(partials[:, 0, 0]) / B


def _reference_loss(embeddings, labels, margin=0.2, squared=False):
    """Pure-JAX reference mirroring the PyTorch implementation."""
    emb = embeddings.astype(jnp.float32)
    lab = labels.astype(jnp.float32)
    dot = jnp.matmul(emb, emb.T, precision=lax.Precision.HIGHEST)
    sq = jnp.diag(dot)
    d = sq[None, :] - 2.0 * dot + sq[:, None]
    d = jnp.maximum(d, 0.0)
    if not squared:
        m = (d == 0.0).astype(jnp.float32)
        d = (1.0 - m) * jnp.sqrt(d + m * 1e-16)
    eye = jnp.eye(emb.shape[0], dtype=bool)
    eq = lab[None, :] == lab[:, None]
    pos = (eq & ~eye).astype(jnp.float32)
    neg = (~eq).astype(jnp.float32)
    hp = jnp.max(pos * d, axis=1, keepdims=True)
    mx = jnp.max(d, axis=1, keepdims=True)
    hn = jnp.min(d + mx * (1.0 - neg), axis=1, keepdims=True)
    return jnp.mean(jnp.maximum(hp - hn + margin, 0.0))


if __name__ == "__main__":
    key = jax.random.PRNGKey(0)
    k1, k2, k3, k4, k5, k6 = jax.random.split(key, 6)

    # Case 1: B multiple of 8, single row/column tile, non-squared distances.
    B, D = 8, 32
    embeddings = jax.random.normal(k1, (B, D), dtype=jnp.float32)
    targets = jax.random.randint(k2, (B,), 0, 3, dtype=jnp.int32)
    loss = hard_triplet_loss(embeddings, targets, margin=0.2, squared=False)
    jax.block_until_ready(loss)
    ref = _reference_loss(embeddings, targets, margin=0.2, squared=False)
    assert jnp.allclose(loss, ref, atol=1e-5, rtol=1e-5), (loss, ref)

    # Case 2: B not a multiple of 8 (row/col padding), squared=True.
    B2, D2 = 13, 48
    embeddings2 = jax.random.normal(k3, (B2, D2), dtype=jnp.float32)
    targets2 = jax.random.randint(k4, (B2,), 0, 4, dtype=jnp.int32)
    loss2 = hard_triplet_loss(embeddings2, targets2, margin=0.5, squared=True)
    jax.block_until_ready(loss2)
    ref2 = _reference_loss(embeddings2, targets2, margin=0.5, squared=True)
    assert jnp.allclose(loss2, ref2, atol=1e-5, rtol=1e-5), (loss2, ref2)

    # Case 3: multi row-tile AND multi column-tile path (exercises the
    # scratch-accumulator reduction across the column grid axis).
    B3, D3 = 200, 64
    embeddings3 = jax.random.normal(k5, (B3, D3), dtype=jnp.float32)
    targets3 = jax.random.randint(k6, (B3,), 0, 10, dtype=jnp.int32)
    loss3 = hard_triplet_loss(embeddings3, targets3, margin=0.3, squared=False,
                              block_rows=64, block_cols=128)
    jax.block_until_ready(loss3)
    ref3 = _reference_loss(embeddings3, targets3, margin=0.3, squared=False)
    assert jnp.allclose(loss3, ref3, atol=1e-4, rtol=1e-4), (loss3, ref3)

    print("KERNEL_OK")
</pallas_src>

<mosaic_0001>
module attributes {stable_mosaic.version = 11 : i64} {
  func.func @_hard_triplet_kernel(%arg0: i32, %arg1: i32, %arg2: memref<8x32xf32, #tpu.memory_space<vmem>>, %arg3: memref<128x32xf32, #tpu.memory_space<vmem>>, %arg4: memref<8x1xf32, #tpu.memory_space<vmem>>, %arg5: memref<1x128xf32, #tpu.memory_space<vmem>>, %arg6: memref<8x1xi32, #tpu.memory_space<vmem>>, %arg7: memref<1x128xi32, #tpu.memory_space<vmem>>, %arg8: memref<1x8x128xf32, #tpu.memory_space<vmem>>, %arg9: memref<8x1xf32, #tpu.memory_space<vmem>>, %arg10: memref<8x1xf32, #tpu.memory_space<vmem>>, %arg11: memref<8x1xf32, #tpu.memory_space<vmem>>) attributes {dimension_semantics = [#tpu.dimension_semantics<parallel>, #tpu.dimension_semantics<arbitrary>], iteration_bounds = array<i64: 1, 1>, scalar_prefetch = 0 : i64, scratch_operands = 3 : i64, tpu.core_type = #tpu.core_type<tc>, window_params = [{transform_indices = @transform_0, window_bounds = array<i64: 8, 32>}, {transform_indices = @transform_1, window_bounds = array<i64: 128, 32>}, {transform_indices = @transform_2, window_bounds = array<i64: 8, 1>}, {transform_indices = @transform_3, window_bounds = array<i64: 1, 128>}, {transform_indices = @transform_4, window_bounds = array<i64: 8, 1>}, {transform_indices = @transform_5, window_bounds = array<i64: 1, 128>}, {transform_indices = @transform_6, window_bounds = array<i64: 1, 8, 128>}]} {
    %c0_i32 = arith.constant 0 : i32
    %0 = arith.cmpi eq, %arg1, %c0_i32 : i32
    %1 = arith.extui %0 : i1 to i32
    %c0_i32_0 = arith.constant 0 : i32
    %2 = arith.cmpi ne, %1, %c0_i32_0 : i32
    scf.if %2 {
      %cst_38 = arith.constant 0.000000e+00 : f32
      %65 = vector.broadcast %cst_38 : f32 to vector<8x1xf32>
      %c0_39 = arith.constant 0 : index
      %c0_40 = arith.constant 0 : index
      %66 = vector.load %arg9[%c0_39, %c0_40] : memref<8x1xf32, #tpu.memory_space<vmem>>, vector<8x1xf32>
      tpu.vector_store %arg9[%c0_39, %c0_40], %65 {strides = array<i32>} : memref<8x1xf32, #tpu.memory_space<vmem>>, vector<8x1xf32>,
      %cst_41 = arith.constant 0x7F800000 : f32
      %67 = vector.broadcast %cst_41 : f32 to vector<8x1xf32>
      %c0_42 = arith.constant 0 : index
      %c0_43 = arith.constant 0 : index
      %68 = vector.load %arg10[%c0_42, %c0_43] : memref<8x1xf32, #tpu.memory_space<vmem>>, vector<8x1xf32>
      tpu.vector_store %arg10[%c0_42, %c0_43], %67 {strides = array<i32>} : memref<8x1xf32, #tpu.memory_space<vmem>>, vector<8x1xf32>,
      %cst_44 = arith.constant 0.000000e+00 : f32
      %69 = vector.broadcast %cst_44 : f32 to vector<8x1xf32>
      %c0_45 = arith.constant 0 : index
      %c0_46 = arith.constant 0 : index
      %70 = vector.load %arg11[%c0_45, %c0_46] : memref<8x1xf32, #tpu.memory_space<vmem>>, vector<8x1xf32>
      tpu.vector_store %arg11[%c0_45, %c0_46], %69 {strides = array<i32>} : memref<8x1xf32, #tpu.memory_space<vmem>>, vector<8x1xf32>,
    } else {
    }
    %c0 = arith.constant 0 : index
    %c0_1 = arith.constant 0 : index
    %3 = vector.load %arg2[%c0, %c0_1] : memref<8x32xf32, #tpu.memory_space<vmem>>, vector<8x32xf32>
    %c0_2 = arith.constant 0 : index
    %c0_3 = arith.constant 0 : index
    %4 = vector.load %arg3[%c0_2, %c0_3] : memref<128x32xf32, #tpu.memory_space<vmem>>, vector<128x32xf32>
    %c0_4 = arith.constant 0 : index
    %c0_5 = arith.constant 0 : index
    %5 = vector.load %arg4[%c0_4, %c0_5] : memref<8x1xf32, #tpu.memory_space<vmem>>, vector<8x1xf32>
    %c0_6 = arith.constant 0 : index
    %c0_7 = arith.constant 0 : index
    %6 = vector.load %arg5[%c0_6, %c0_7] : memref<1x128xf32, #tpu.memory_space<vmem>>, vector<1x128xf32>
    %c0_8 = arith.constant 0 : index
    %c0_9 = arith.constant 0 : index
    %7 = vector.load %arg6[%c0_8, %c0_9] : memref<8x1xi32, #tpu.memory_space<vmem>>, vector<8x1xi32>
    %c0_10 = arith.constant 0 : index
    %c0_11 = arith.constant 0 : index
    %8 = vector.load %arg7[%c0_10, %c0_11] : memref<1x128xi32, #tpu.memory_space<vmem>>, vector<1x128xi32>
    %cst = arith.constant dense<0.000000e+00> : vector<8x128xf32>
    %9 = tpu.matmul %3, %4, %cst {dimension_numbers = #tpu.dot_dimension_numbers<[1], [1], [0], [0], [0, 0, 1, 0], [], []>} : vector<8x32xf32>, vector<128x32xf32>, vector<8x128xf32> -> vector<8x128xf32>
    %cst_12 = arith.constant 2.000000e+00 : f32
    %10 = vector.broadcast %cst_12 : f32 to vector<8x128xf32>
    %11 = arith.mulf %10, %9 : vector<8x128xf32>
    %12 = vector.broadcast %5 : vector<8x1xf32> to vector<8x128xf32>
    %13 = arith.subf %12, %11 : vector<8x128xf32>
    %14 = vector.broadcast %6 : vector<1x128xf32> to vector<8x128xf32>
    %15 = arith.addf %13, %14 : vector<8x128xf32>
    %cst_13 = arith.constant 0.000000e+00 : f32
    %16 = vector.broadcast %cst_13 : f32 to vector<8x128xf32>
    %17 = arith.maximumf %15, %16 : vector<8x128xf32>
    %cst_14 = arith.constant 0.000000e+00 : f32
    %18 = vector.broadcast %cst_14 : f32 to vector<8x128xf32>
    %19 = arith.cmpf ogt, %17, %18 : vector<8x128xf32>
    %20 = math.sqrt %17 : vector<8x128xf32>
    %cst_15 = arith.constant 0.000000e+00 : f32
    %21 = vector.broadcast %cst_15 : f32 to vector<8x128xf32>
    %22 = arith.select %19, %20, %21 : vector<8x128xi1>, vector<8x128xf32>
    %c8_i32 = arith.constant 8 : i32
    %23 = arith.muli %arg0, %c8_i32 : i32
    %24 = tpu.iota {dimensions = array<i32: 0>} : vector<8x128xi32>
    %25 = vector.broadcast %23 : i32 to vector<8x128xi32>
    %26 = arith.addi %25, %24 : vector<8x128xi32>
    %c128_i32 = arith.constant 128 : i32
    %27 = arith.muli %arg1, %c128_i32 : i32
    %28 = tpu.iota {dimensions = array<i32: 1>} : vector<8x128xi32>
    %29 = vector.broadcast %27 : i32 to vector<8x128xi32>
    %30 = arith.addi %29, %28 : vector<8x128xi32>
    %31 = arith.cmpi ne, %26, %30 : vector<8x128xi32>
    %c8_i32_16 = arith.constant 8 : i32
    %32 = vector.broadcast %c8_i32_16 : i32 to vector<8x128xi32>
    %33 = arith.cmpi slt, %30, %32 : vector<8x128xi32>
    %34 = vector.broadcast %7 : vector<8x1xi32> to vector<8x128xi32>
    %35 = vector.broadcast %8 : vector<1x128xi32> to vector<8x128xi32>
    %36 = arith.cmpi eq, %34, %35 : vector<8x128xi32>
    %37 = arith.andi %36, %31 : vector<8x128xi1>
    %38 = arith.andi %37, %33 : vector<8x128xi1>
    %cst_17 = arith.constant dense<true> : vector<8x128xi1>
    %39 = arith.xori %36, %cst_17 : vector<8x128xi1>
    %40 = arith.andi %39, %33 : vector<8x128xi1>
    %cst_18 = arith.constant 0.000000e+00 : f32
    %41 = vector.broadcast %cst_18 : f32 to vector<8x128xf32>
    %42 = arith.select %38, %22, %41 : vector<8x128xi1>, vector<8x128xf32>
    %cst_19 = arith.constant dense<0xFF800000> : vector<8xf32>
    %43 = vector.multi_reduction <maximumf>, %42, %cst_19 [1] : vector<8x128xf32> to vector<8xf32>
    %44 = vector.shape_cast %43 : vector<8xf32> to vector<8x1xf32>
    %cst_20 = arith.constant 0x7F800000 : f32
    %45 = vector.broadcast %cst_20 : f32 to vector<8x128xf32>
    %46 = arith.select %40, %22, %45 : vector<8x128xi1>, vector<8x128xf32>
    %cst_21 = arith.constant dense<0x7F800000> : vector<8xf32>
    %47 = vector.multi_reduction <minimumf>, %46, %cst_21 [1] : vector<8x128xf32> to vector<8xf32>
    %48 = vector.shape_cast %47 : vector<8xf32> to vector<8x1xf32>
    %cst_22 = arith.constant 0.000000e+00 : f32
    %49 = vector.broadcast %cst_22 : f32 to vector<8x128xf32>
    %50 = arith.select %33, %22, %49 : vector<8x128xi1>, vector<8x128xf32>
    %cst_23 = arith.constant dense<0xFF800000> : vector<8xf32>
    %51 = vector.multi_reduction <maximumf>, %50, %cst_23 [1] : vector<8x128xf32> to vector<8xf32>
    %52 = vector.shape_cast %51 : vector<8xf32> to vector<8x1xf32>
    %c0_24 = arith.constant 0 : index
    %c0_25 = arith.constant 0 : index
    %53 = vector.load %arg9[%c0_24, %c0_25] : memref<8x1xf32, #tpu.memory_space<vmem>>, vector<8x1xf32>
    %54 = arith.maximumf %53, %44 : vector<8x1xf32>
    %c0_26 = arith.constant 0 : index
    %c0_27 = arith.constant 0 : index
    %55 = vector.load %arg9[%c0_26, %c0_27] : memref<8x1xf32, #tpu.memory_space<vmem>>, vector<8x1xf32>
    tpu.vector_store %arg9[%c0_26, %c0_27], %54 {strides = array<i32>} : memref<8x1xf32, #tpu.memory_space<vmem>>, vector<8x1xf32>,
    %c0_28 = arith.constant 0 : index
    %c0_29 = arith.constant 0 : index
    %56 = vector.load %arg10[%c0_28, %c0_29] : memref<8x1xf32, #tpu.memory_space<vmem>>, vector<8x1xf32>
    %57 = arith.minimumf %56, %48 : vector<8x1xf32>
    %c0_30 = arith.constant 0 : index
    %c0_31 = arith.constant 0 : index
    %58 = vector.load %arg10[%c0_30, %c0_31] : memref<8x1xf32, #tpu.memory_space<vmem>>, vector<8x1xf32>
    tpu.vector_store %arg10[%c0_30, %c0_31], %57 {strides = array<i32>} : memref<8x1xf32, #tpu.memory_space<vmem>>, vector<8x1xf32>,
    %c0_32 = arith.constant 0 : index
    %c0_33 = arith.constant 0 : index
    %59 = vector.load %arg11[%c0_32, %c0_33] : memref<8x1xf32, #tpu.memory_space<vmem>>, vector<8x1xf32>
    %60 = arith.maximumf %59, %52 : vector<8x1xf32>
    %c0_34 = arith.constant 0 : index
    %c0_35 = arith.constant 0 : index
    %61 = vector.load %arg11[%c0_34, %c0_35] : memref<8x1xf32, #tpu.memory_space<vmem>>, vector<8x1xf32>
    tpu.vector_store %arg11[%c0_34, %c0_35], %60 {strides = array<i32>} : memref<8x1xf32, #tpu.memory_space<vmem>>, vector<8x1xf32>,
    %c0_i32_36 = arith.constant 0 : i32
    %62 = arith.cmpi eq, %arg1, %c0_i32_36 : i32
    %63 = arith.extui %62 : i1 to i32
    %c0_i32_37 = arith.constant 0 : i32
    %64 = arith.cmpi ne, %63, %c0_i32_37 : i32
    scf.if %64 {
      %c0_38 = arith.constant 0 : index
      %c0_39 = arith.constant 0 : index
      %65 = vector.load %arg9[%c0_38, %c0_39] : memref<8x1xf32, #tpu.memory_space<vmem>>, vector<8x1xf32>
      %c0_40 = arith.constant 0 : index
      %c0_41 = arith.constant 0 : index
      %66 = vector.load %arg10[%c0_40, %c0_41] : memref<8x1xf32, #tpu.memory_space<vmem>>, vector<8x1xf32>
      %c0_42 = arith.constant 0 : index
      %c0_43 = arith.constant 0 : index
      %67 = vector.load %arg11[%c0_42, %c0_43] : memref<8x1xf32, #tpu.memory_space<vmem>>, vector<8x1xf32>
      %68 = arith.minimumf %66, %67 : vector<8x1xf32>
      %69 = arith.subf %65, %68 : vector<8x1xf32>
      %cst_44 = arith.constant 2.000000e-01 : f32
      %70 = vector.broadcast %cst_44 : f32 to vector<8x1xf32>
      %71 = arith.addf %69, %70 : vector<8x1xf32>
      %cst_45 = arith.constant 0.000000e+00 : f32
      %72 = vector.broadcast %cst_45 : f32 to vector<8x1xf32>
      %73 = arith.maximumf %71, %72 : vector<8x1xf32>
      %c8_i32_46 = arith.constant 8 : i32
      %74 = arith.muli %arg0, %c8_i32_46 : i32
      %75 = tpu.iota {dimensions = array<i32: 0>} : vector<8x1xi32>
      %76 = vector.broadcast %74 : i32 to vector<8x1xi32>
      %77 = arith.addi %76, %75 : vector<8x1xi32>
      %c8_i32_47 = arith.constant 8 : i32
      %78 = vector.broadcast %c8_i32_47 : i32 to vector<8x1xi32>
      %79 = arith.cmpi slt, %77, %78 : vector<8x1xi32>
      %cst_48 = arith.constant 0.000000e+00 : f32
      %80 = vector.broadcast %cst_48 : f32 to vector<8x1xf32>
      %81 = arith.select %79, %73, %80 : vector<8x1xi1>, vector<8x1xf32>
      %82 = vector.shape_cast %81 : vector<8x1xf32> to vector<1x8x1xf32>
      %cst_49 = arith.constant dense<0.000000e+00> : vector<1xf32>
      %83 = vector.multi_reduction <add>, %82, %cst_49 [1, 2] : vector<1x8x1xf32> to vector<1xf32>
      %84 = vector.shape_cast %83 : vector<1xf32> to vector<1x1x1xf32>
      %85 = vector.extract %84[0, 0, 0] : f32 from vector<1x1x1xf32>
      %86 = vector.broadcast %85 : f32 to vector<1x8x128xf32>
      %c0_50 = arith.constant 0 : index
      %c0_51 = arith.constant 0 : index
      %c0_52 = arith.constant 0 : index
      %87 = vector.load %arg8[%c0_50, %c0_51, %c0_52] : memref<1x8x128xf32, #tpu.memory_space<vmem>>, vector<1x8x128xf32>
      tpu.vector_store %arg8[%c0_50, %c0_51, %c0_52], %86 {strides = array<i32>} : memref<1x8x128xf32, #tpu.memory_space<vmem>>, vector<1x8x128xf32>,
    } else {
    }
    return
  }
  func.func @transform_0(%arg0: i32, %arg1: i32) -> (i32, i32) {
    %c0_i32 = arith.constant 0 : i32
    %c0_i32_0 = arith.constant 0 : i32
    return %arg0, %c0_i32 : i32, i32
  }
  func.func @transform_1(%arg0: i32, %arg1: i32) -> (i32, i32) {
    %c0_i32 = arith.constant 0 : i32
    %c0_i32_0 = arith.constant 0 : i32
    return %arg1, %c0_i32 : i32, i32
  }
  func.func @transform_2(%arg0: i32, %arg1: i32) -> (i32, i32) {
    %c0_i32 = arith.constant 0 : i32
    %c0_i32_0 = arith.constant 0 : i32
    return %arg0, %c0_i32 : i32, i32
  }
  func.func @transform_3(%arg0: i32, %arg1: i32) -> (i32, i32) {
    %c0_i32 = arith.constant 0 : i32
    %c0_i32_0 = arith.constant 0 : i32
    return %c0_i32, %arg1 : i32, i32
  }
  func.func @transform_4(%arg0: i32, %arg1: i32) -> (i32, i32) {
    %c0_i32 = arith.constant 0 : i32
    %c0_i32_0 = arith.constant 0 : i32
    return %arg0, %c0_i32 : i32, i32
  }
  func.func @transform_5(%arg0: i32, %arg1: i32) -> (i32, i32) {
    %c0_i32 = arith.constant 0 : i32
    %c0_i32_0 = arith.constant 0 : i32
    return %c0_i32, %arg1 : i32, i32
  }
  func.func @transform_6(%arg0: i32, %arg1: i32) -> (i32, i32, i32) {
    %c0_i32 = arith.constant 0 : i32
    %c0_i32_0 = arith.constant 0 : i32
    %c0_i32_1 = arith.constant 0 : i32
    return %arg0, %c0_i32, %c0_i32_0 : i32, i32, i32
  }
}

</mosaic_0001>

<bundles_post_ra>
// kernel: tpu_custom_call.1
= control target key start
LH: loop header
LB: loop body
LE: loop exit
PB: predicated region body
PF: predicated region fallthrough
CT: control target
= control target key end

     0   :  { %vm53_vm0 = vcmask 261120   ;;  %v384_v1 = vmov 0.0   ;;  %vm385_vm1 = vmmov 0   ;;  %v386_v2 = vmov 0   ;;  %s537_s0 = inlined_call_operand.vmem [shape: f32[8,32], index: 0, kind: input, shape index: {}]   ;;  %s538_s1 = inlined_call_operand.vmem [shape: f32[128,32], index: 1, kind: input, shape index: {}]   ;;  %s539_s2 = inlined_call_operand.vmem [shape: f32[8,1], index: 2, kind: input, shape index: {}]   ;;  %s540_s3 = inlined_call_operand.vmem [shape: f32[1,128], index: 3, kind: input, shape index: {}]   ;;  %s541_s4 = inlined_call_operand.vmem [shape: s32[8,1], index: 4, kind: input, shape index: {}]   ;;  %s542_s5 = inlined_call_operand.vmem [shape: s32[1,128], index: 5, kind: input, shape index: {}]   ;;  %s543_s6 = inlined_call_operand.hbm [shape: f32[1,8,128], index: 6, kind: output, shape index: {}]  }
   0x1   :  { %v48_v0 = vld [vmem:[%s538_s1 + $0x78] sm:$0xff]  ;;  %316 = vmatprep.subr.mxu0 %v384_v1  ;;  %348 = vmatprep.mubr.msk.f32.mxu0 %vm385_vm1, %v384_v1  ;;  %v47_v3 = vld [vmem:[%s538_s1 + $0x70] sm:$0xff]  ;;  %v49_v4 = vld [vmem:[%s539_s2] sm:$0xff] }
   0x2   :  { %317 = vmatpush3.xpose.msk.msra.mxu0 %vm53_vm0, %v48_v0  ;;  %359 = vset.pattern.permute.xlu0 %v386_v2 }
   0x3   :  { %318 = vmatprep.subr.mxu0 %v384_v1  ;;  %178 = vperm.xlu0 %359, %v49_v4  }
   0x6   :  { %319 = vmatpush3.xpose.msk.msra.mxu0 %vm53_vm0, %v47_v3 }
   0x7   :  { %11 = vsyncpa [#allocation6], 0  ;;  %320 = vmatprep.subr.mxu0 %v384_v1  ;;  %v46_v5 = vld [vmem:[%s538_s1 + $0x68] sm:$0xff]  ;;  %v51_v6 = vld [vmem:[%s541_s4] sm:$0xff]  ;;  %v200_v29 = vlaneseq  ;;  %vm387_vm4 = vmmov 1   ;;  %vm28_vm13 = vcmask 7168  }
   0x8   :  { %212 = vperm.xlu0 %359, %v51_v6   ;;  %v45_v7 = vld [vmem:[%s538_s1 + $0x60] sm:$0xff]  ;;  %v44_v8 = vld [vmem:[%s538_s1 + $0x58] sm:$0xff]  ;;  %v43_v9 = vld [vmem:[%s538_s1 + $0x50] sm:$0xff]  ;;  %v388_v43 = vmov inf   ;;  %29 = vst.msk [vmem:[#allocation2] sm:$0xff] %vm28_vm13, %v384_v1 }
   0x9   :  { %v42_v10 = vld [vmem:[%s538_s1 + $0x48] sm:$0xff]  ;;  %v41_v11 = vld [vmem:[%s538_s1 + $0x40] sm:$0xff]  ;;  %v40_v12 = vld [vmem:[%s538_s1 + $0x38] sm:$0xff]  ;;  %v201_v31 = vshrl.u32 %v200_v29, 7  ;;  %v206_v32 = vand.u32 127, %v200_v29  ;;  %30 = vst.msk [vmem:[#allocation3] sm:$0xff] %vm28_vm13, %v388_v43 }
   0xa   :  { %321 = vmatpush3.xpose.msk.msra.mxu0 %vm53_vm0, %v46_v5  ;;  %v39_v13 = vld [vmem:[%s538_s1 + $0x30] sm:$0xff]  ;;  %v38_v14 = vld [vmem:[%s538_s1 + $0x28] sm:$0xff]  ;;  %v37_v15 = vld [vmem:[%s538_s1 + $0x20] sm:$0xff]  ;;  %31 = vst.msk [vmem:[#allocation4] sm:$0xff] %vm28_vm13, %v384_v1 }
   0xb   :  { %322 = vmatprep.subr.mxu0 %v384_v1  ;;  %v36_v16 = vld [vmem:[%s538_s1 + $0x18] sm:$0xff]  ;;  %v35_v17 = vld [vmem:[%s538_s1 + $0x10] sm:$0xff]  ;;  %v34_v18 = vld [vmem:[%s538_s1 + $0x8] sm:$0xff]  ;;  %vm209_vm3 = vcmp.ne.s32.totalorder %v201_v31, %v206_v32  ;;  %vm210_vm6 = vcmp.lt.s32.totalorder %v206_v32, 8 }
   0xc   :  { %v33_v19 = vld [vmem:[%s538_s1] sm:$0xff] }
   0xd   :  { %v32_v20 = vld [vmem:[%s537_s0] sm:$0xff]  ;;  %s389_s0 = smov [#allocation5]  }
   0xe   :  { %323 = vmatpush3.xpose.msk.msra.mxu0 %vm53_vm0, %v45_v7  ;;  %v297_v24 = vld [vmem:[%s540_s3] ss:$0 sm:$0xff]  ;;  %s272_s3 = sshll.u32 %s389_s0, 4  ;;  %s273_s3 = int_to_ptr.vmem [resolvable:$true] %s272_s3 }
   0xf   :  { %324 = vmatprep.subr.mxu0 %v384_v1  ;;  %v298_v30 = vld [vmem:[%s542_s5] ss:$0 sm:$0xff]  ;;  %s362_s10 = scalar_lea.vmem %s273_s3, 128  ;;  %p367_p1 = scmp.lt.s32.totalorder %s273_s3, %s273_s3 }
  0x10   :  { %v236_v44 = vld [vmem:[#allocation3] sm:$0xff]  ;;  %v232_v45 = vld [vmem:[#allocation2] sm:$0xff]  ;;  %p363_p0 = scmp.ne.s32.totalorder %s273_s3, %s362_s10  ;;  %p368_p2 = scmp.lt.s32.totalorder %s362_s10, %s362_s10 }
  0x11   :  { %v239_v50 = vld [vmem:[#allocation4] sm:$0xff] }
  0x12   :  { %325 = vmatpush3.xpose.msk.msra.mxu0 %vm53_vm0, %v44_v8  ;;  %p369_p3 = por %p368_p2, %p367_p1 }
  0x13   :  { %326 = vmatprep.subr.mxu0 %v384_v1 }
  0x14   :  { %p370_p4 = pnand %p369_p3, %p363_p0 }
  0x16   :  { %327 = vmatpush3.xpose.msk.msra.mxu0 %vm53_vm0, %v43_v9 }
  0x17   :  { %328 = vmatprep.subr.mxu0 %v384_v1 }
  0x1a   :  { %329 = vmatpush3.xpose.msk.msra.mxu0 %vm53_vm0, %v42_v10 }
  0x1b   :  { %330 = vmatprep.subr.mxu0 %v384_v1 }
  0x1e   :  { %331 = vmatpush3.xpose.msk.msra.mxu0 %vm53_vm0, %v41_v11 }
  0x1f   :  { %332 = vmatprep.subr.mxu0 %v384_v1 }
  0x22   :  { %333 = vmatpush3.xpose.msk.msra.mxu0 %vm53_vm0, %v40_v12 }
  0x23   :  { %334 = vmatprep.subr.mxu0 %v384_v1 }
  0x26   :  { %335 = vmatpush3.xpose.msk.msra.mxu0 %vm53_vm0, %v39_v13 }
  0x27   :  { %336 = vmatprep.subr.mxu0 %v384_v1 }
  0x2a   :  { %337 = vmatpush3.xpose.msk.msra.mxu0 %vm53_vm0, %v38_v14 }
  0x2b   :  { %338 = vmatprep.subr.mxu0 %v384_v1 }
  0x2e   :  { %339 = vmatpush3.xpose.msk.msra.mxu0 %vm53_vm0, %v37_v15 }
  0x2f   :  { %340 = vmatprep.subr.mxu0 %v384_v1 }
  0x32   :  { %341 = vmatpush3.xpose.msk.msra.mxu0 %vm53_vm0, %v36_v16 }
  0x33   :  { %342 = vmatprep.subr.mxu0 %v384_v1 }
  0x36   :  { %343 = vmatpush3.xpose.msk.msra.mxu0 %vm53_vm0, %v35_v17 }
  0x37   :  { %344 = vmatprep.subr.mxu0 %v384_v1 }
  0x3a   :  { %345 = vmatpush3.xpose.msk.msra.mxu0 %vm53_vm0, %v34_v18 }
  0x3b   :  { %346 = vmatprep.subr.mxu0 %v384_v1 }
  0x3e   :  { %347 = vmatpush3.xpose.msk.msra.mxu0 %vm53_vm0, %v33_v19 }
  0x41   :  { %349 = vmatmul.mubr.msk.f32.vlgmr.msra.gmra.mxu0 %vm53_vm0, %v32_v20 }
  0x7e   :  { %v179_v23 = vpop.permute.xlu0 %178 }
  0x83   :  { %v213_v33 = vpop.permute.xlu0 %212 }
  0x84   :  { %vm218_vm2 = vcmp.eq.s32.totalorder %v213_v33, %v298_v30 }
  0x85   :  { %vm221_vm5 = vmxor %vm218_vm2, %vm387_vm4 }
  0x86   :  { %vm219_vm7 = vmand %vm218_vm2, %vm209_vm3 }
  0x87   :  { %vm222_vm11 = vmand %vm221_vm5, %vm210_vm6 }
  0x88   :  { %vm220_vm12 = vmand %vm219_vm7, %vm210_vm6 }
 0x101   :  { %v171_v21 = vpop.f32.mrf.mxu0 }
 0x102   :  { %v175_v22 = vmul.f32 2.0, %v171_v21 }
 0x103   :  { %v350_v25 = vpop.f32.mrf.mxu0 }
 0x104   :  { %v181_v26 = vsub.f32 %v179_v23, %v175_v22 }
 0x106   :  { %v188_v27 = vadd.f32 %v297_v24, %v181_v26 }
 0x108   :  { %v189_v28 = vmax.f32 %v188_v27, 0.0 }
 0x10a   :  { %360 = vrsqrt.f32 %v189_v28  ;;  %vm193_vm8 = vcmp.eq.f32.partialorder %v189_v28, inf  ;;  %v196_v36 = vand.u32 2147483648, %v189_v28  ;;  %vm195_vm9 = vcmp.eq.f32.partialorder %v189_v28, 0.0 }
 0x10b   :  { %vm190_vm10 = vcmp.gt.f32.partialorder %v189_v28, 0.0 }
 0x117   :  { %v361_v34 = vpop.eup %360 }
 0x118   :  { %v192_v35 = vmul.f32 %v361_v34, %v189_v28 }
 0x11a   :  { %v194_v37 = vsel %vm193_vm8, %v189_v28, %v192_v35 }
 0x11b   :  { %v197_v38 = vsel %vm195_vm9, %v196_v36, %v194_v37 }
 0x11c   :  { %v198_v39 = vsel %vm190_vm10, %v197_v38, 0.0 }
 0x11d   :  { %v226_v40 = vsel %vm222_vm11, %v198_v39, inf  ;;  %v223_v41 = vsel %vm220_vm12, %v198_v39, 0.0  ;;  %v229_v42 = vsel %vm210_vm6, %v198_v39, 0.0 }
 0x11e   :  { %227 = vmin.xlane.f32.xlu1 %v226_v40  ;;  %224 = vmax.xlane.f32.xlu0 %v223_v41 }
 0x122   :  { %230 = vmax.xlane.f32.xlu1 %v229_v42 }
 0x1a7   :  { %v228_v46 = vpop.xlane.xlu1 %227  ;;  %v225_v47 = vpop.xlane.xlu0 %224 }
 0x1a8   :  { %v237_v48 = vmin.f32 %v236_v44, %v228_v46  ;;  %v233_v49 = vmax.f32 %v232_v45, %v225_v47 }
 0x1aa   :  { %238 = vst.msk [vmem:[#allocation3] sm:$0xff] %vm28_vm13, %v237_v48  ;;  %235 = vst.msk [vmem:[#allocation2] sm:$0xff] %vm28_vm13, %v233_v49 }
 0x1ab   :  { %v231_v51 = vpop.xlane.xlu1 %230 }
 0x1ac   :  { %v240_v52 = vmax.f32 %v239_v50, %v231_v51 }
 0x1ae   :  { %241 = vst.msk [vmem:[#allocation4] sm:$0xff] %vm28_vm13, %v240_v52 }
 0x1b1   :  { %v246_v53 = vld [vmem:[#allocation3] sm:$0xff]  ;;  %v245_v56 = vld [vmem:[#allocation2] sm:$0xff] }
 0x1b5   :  { %v247_v54 = vld [vmem:[#allocation4] sm:$0xff] }
 0x1b6   :  { %v248_v55 = vmin.f32 %v246_v53, %v247_v54 }
 0x1b8   :  { %v249_v57 = vsub.f32 %v245_v56, %v248_v55 }
 0x1ba   :  { %v250_v58 = vadd.f32 0.2, %v249_v57 }
 0x1bc   :  { %v251_v59 = vmax.f32 %v250_v58, 0.0 }
 0x1be   :  { %v254_v60 = vsel %vm28_vm13, %v251_v59, 0.0 }
 0x1bf   :  { %255 = vadd.xlane.f32.xlu1 %v254_v60 }
 0x248   :  { %v256_v61 = vpop.xlane.xlu1 %255 }
 0x249   :  { %v257_v62 = vrot.slane %v256_v61, 4 }
 0x24b   :  { %v258_v63 = vadd.f32 %v257_v62, %v256_v61 }
 0x24d   :  { %v259_v0 = vrot.slane %v258_v63, 2 }
 0x24f   :  { %v260_v1 = vadd.f32 %v259_v0, %v258_v63 }
 0x251   :  { %v261_v2 = vrot.slane %v260_v1, 1 }
 0x253   :  { %v262_v3 = vadd.f32 %v261_v2, %v260_v1 }
 0x255   :  { %351 = vpush %v262_v3 }
 0x286   :  { %s352_s5 = spop %351 }
 0x287   :  { %v264_v4 = vstv %s352_s5 }
 0x288   :  { %265 = vst [vmem:[#allocation5] sm:$0xff] %v264_v4 }
 0x289   :  { %373 = shalt.err (!%p370_p4)
}
 0x28a   :  { %275 = dma.vmem_to_hbm [thread:$0]  %s273_s3, 128, %s543_s6, [#allocation6]  }
 0x28b   :  { %382 = dma.done.wait [#allocation6], 128  }
 0x28c   :  { %383 = vsyncadd [#allocation6], 4294967168 }
 0x28d   :  { %279 = vsyncpa [#allocation6], 1 }

</bundles_post_ra>
